<compile_context>
chip_gen: v7x
topology: tpu7x:2x2x1
jax: 0.10.0
libtpu: 0.0.40
codegen_flags: <defaults>
</compile_context>

<pallas_src>
import jax
import jax.numpy as jnp
from jax.experimental import pallas as pl
from jax.experimental.pallas import tpu as pltpu

IN_DIM = 150          # fixed by the module (SVD-reduced to 150)
LANE = 128
IN_PAD = 256          # next multiple of 128 above 150


def _round_up(n, m):
    return ((n + m - 1) // m) * m


def svd_fc_kernel(x_ref, w1_ref, b1_ref, w2_ref, b2_ref, enc_ref, dec_ref):
    x = x_ref[...]

    # Encoder: Linear(150 -> hidden_1) + Sigmoid (MXU matmul, f32 accumulate).
    h1 = jnp.dot(x, w1_ref[...], preferred_element_type=jnp.float32) + b1_ref[...]
    encoded = jax.nn.sigmoid(h1)                      # f32 elementwise (EUP exp)
    enc_ref[...] = encoded.astype(enc_ref.dtype)

    # Decoder: Linear(hidden_1 -> 150) + Sigmoid. Keep the two dots adjacent.
    h2 = jnp.dot(encoded.astype(w2_ref.dtype), w2_ref[...],
                 preferred_element_type=jnp.float32) + b2_ref[...]
    dec_ref[...] = jax.nn.sigmoid(h2).astype(dec_ref.dtype)


def svd_fc_forward(x, w1, b1, w2, b2, *, block_b=512, matmul_dtype=None):
    """x: (B, 150); w1: (150, H); b1: (1, H); w2: (H, 150); b2: (1, 150).

    matmul_dtype: dtype for the MXU operands (e.g. jnp.bfloat16 on v6e/v7x).
                  Accumulation, bias-add and sigmoid are always float32.
    Returns (encoded (B, H), decoded (B, 150)) in x.dtype.
    """
    B = x.shape[0]
    H = w1.shape[1]
    H_pad = _round_up(H, LANE)

    out_dtype = x.dtype
    mm_dtype = jnp.dtype(matmul_dtype) if matmul_dtype is not None else jnp.dtype(x.dtype)

    # Row-block size: large (512) for real batches, rounded-up batch otherwise.
    TB = min(block_b, _round_up(B, 8))
    B_pad = _round_up(B, TB)
    grid = (B_pad // TB,)

    # Zero-pad everything to lane-aligned shapes (zeros keep the math exact).
    xp = jnp.pad(x.astype(mm_dtype), ((0, B_pad - B), (0, IN_PAD - IN_DIM)))
    w1p = jnp.pad(w1.astype(mm_dtype), ((0, IN_PAD - IN_DIM), (0, H_pad - H)))
    b1p = jnp.pad(b1.astype(jnp.float32), ((0, 0), (0, H_pad - H)))
    w2p = jnp.pad(w2.astype(mm_dtype), ((0, H_pad - H), (0, IN_PAD - IN_DIM)))
    b2p = jnp.pad(b2.astype(jnp.float32), ((0, 0), (0, IN_PAD - IN_DIM)))

    mm_bytes = jnp.dtype(mm_dtype).itemsize
    out_bytes = jnp.dtype(out_dtype).itemsize
    cost = pl.CostEstimate(
        flops=4 * B_pad * IN_PAD * H_pad,                      # two matmuls
        transcendentals=B_pad * (H_pad + IN_PAD),              # sigmoid exps
        bytes_accessed=(B_pad * IN_PAD * mm_bytes              # x
                        + (IN_PAD * H_pad + H_pad * IN_PAD) * mm_bytes  # w1, w2
                        + (H_pad + IN_PAD) * 4                 # biases
                        + B_pad * H_pad * out_bytes            # encoded
                        + B_pad * IN_PAD * out_bytes))         # decoded

    encoded_p, decoded_p = pl.pallas_call(
        svd_fc_kernel,
        grid=grid,
        out_shape=(
            jax.ShapeDtypeStruct((B_pad, H_pad), out_dtype),
            jax.ShapeDtypeStruct((B_pad, IN_PAD), out_dtype),
        ),
        in_specs=[
            pl.BlockSpec((TB, IN_PAD), lambda i: (i, 0)),      # x row-block
            pl.BlockSpec((IN_PAD, H_pad), lambda i: (0, 0)),   # w1: VMEM-resident
            pl.BlockSpec((1, H_pad), lambda i: (0, 0)),        # b1: VMEM-resident
            pl.BlockSpec((H_pad, IN_PAD), lambda i: (0, 0)),   # w2: VMEM-resident
            pl.BlockSpec((1, IN_PAD), lambda i: (0, 0)),       # b2: VMEM-resident
        ],
        out_specs=(
            pl.BlockSpec((TB, H_pad), lambda i: (i, 0)),
            pl.BlockSpec((TB, IN_PAD), lambda i: (i, 0)),
        ),
        compiler_params=pltpu.CompilerParams(
            dimension_semantics=("parallel",),
        ),
        cost_estimate=cost,
    )(xp, w1p, b1p, w2p, b2p)

    # Slice back to the logical (unpadded) shapes.
    return encoded_p[:B, :H], decoded_p[:B, :IN_DIM]


def init_params(key, hidden_1):
    """Deterministic init mimicking nn.Linear's uniform(-1/sqrt(fan_in), 1/sqrt(fan_in)).

    Weights are stored already transposed to (in, out) for the kernel.
    """
    k1, k2, k3, k4 = jax.random.split(key, 4)
    bound1 = 1.0 / jnp.sqrt(jnp.float32(IN_DIM))
    bound2 = 1.0 / jnp.sqrt(jnp.float32(hidden_1))
    w1 = jax.random.uniform(k1, (IN_DIM, hidden_1), jnp.float32, -bound1, bound1)
    b1 = jax.random.uniform(k2, (1, hidden_1), jnp.float32, -bound1, bound1)
    w2 = jax.random.uniform(k3, (hidden_1, IN_DIM), jnp.float32, -bound2, bound2)
    b2 = jax.random.uniform(k4, (1, IN_DIM), jnp.float32, -bound2, bound2)
    return w1, b1, w2, b2


if __name__ == "__main__":
    hidden_1 = 32
    batch = 8

    key = jax.random.PRNGKey(0)
    kx, kp = jax.random.split(key)
    x = jax.random.normal(kx, (batch, IN_DIM), jnp.float32)
    w1, b1, w2, b2 = init_params(kp, hidden_1)

    fwd = jax.jit(svd_fc_forward, static_argnames=("block_b", "matmul_dtype"))

    # --- f32 path (exact against the pure-JAX reference) ---
    encoded, decoded = fwd(x, w1, b1, w2, b2)
    jax.block_until_ready((encoded, decoded))

    enc_ref = jax.nn.sigmoid(x @ w1 + b1)
    dec_ref = jax.nn.sigmoid(enc_ref @ w2 + b2)
    assert encoded.shape == (batch, hidden_1)
    assert decoded.shape == (batch, IN_DIM)
    assert jnp.allclose(encoded, enc_ref, atol=1e-5)
    assert jnp.allclose(decoded, dec_ref, atol=1e-5)

    # --- bf16-operand path (recommended on v6e/v7x), compared against a
    #     bf16-emulated reference with a looser tolerance ---
    encoded_bf, decoded_bf = fwd(x, w1, b1, w2, b2, matmul_dtype=jnp.bfloat16)
    jax.block_until_ready((encoded_bf, decoded_bf))

    xb = x.astype(jnp.bfloat16).astype(jnp.float32)
    w1b = w1.astype(jnp.bfloat16).astype(jnp.float32)
    w2b = w2.astype(jnp.bfloat16).astype(jnp.float32)
    enc_bref = jax.nn.sigmoid(xb @ w1b + b1)
    dec_bref = jax.nn.sigmoid(enc_bref.astype(jnp.bfloat16).astype(jnp.float32) @ w2b + b2)
    assert jnp.allclose(encoded_bf, enc_bref, atol=5e-3)
    assert jnp.allclose(decoded_bf, dec_bref, atol=5e-3)

    print("KERNEL_OK")
</pallas_src>

<mosaic_0001>
module attributes {stable_mosaic.version = 11 : i64} {
  func.func @svd_fc_kernel(%arg0: i32, %arg1: memref<8x256xf32, #tpu.memory_space<vmem>>, %arg2: memref<256x128xf32, #tpu.memory_space<vmem>>, %arg3: memref<1x128xf32, #tpu.memory_space<vmem>>, %arg4: memref<128x256xf32, #tpu.memory_space<vmem>>, %arg5: memref<1x256xf32, #tpu.memory_space<vmem>>, %arg6: memref<8x128xf32, #tpu.memory_space<vmem>>, %arg7: memref<8x256xf32, #tpu.memory_space<vmem>>) attributes {dimension_semantics = [#tpu.dimension_semantics<parallel>], iteration_bounds = array<i64: 1>, scalar_prefetch = 0 : i64, scratch_operands = 0 : i64, tpu.core_type = #tpu.core_type<tc>, window_params = [{transform_indices = @transform_0, window_bounds = array<i64: 8, 256>}, {pipeline_mode = #tpu.pipeline_mode<synchronous>, transform_indices = @transform_1, window_bounds = array<i64: 256, 128>}, {pipeline_mode = #tpu.pipeline_mode<synchronous>, transform_indices = @transform_2, window_bounds = array<i64: 1, 128>}, {pipeline_mode = #tpu.pipeline_mode<synchronous>, transform_indices = @transform_3, window_bounds = array<i64: 128, 256>}, {pipeline_mode = #tpu.pipeline_mode<synchronous>, transform_indices = @transform_4, window_bounds = array<i64: 1, 256>}, {transform_indices = @transform_5, window_bounds = array<i64: 8, 128>}, {transform_indices = @transform_6, window_bounds = array<i64: 8, 256>}]} {
    %c0 = arith.constant 0 : index
    %c0_0 = arith.constant 0 : index
    %0 = vector.load %arg1[%c0, %c0_0] : memref<8x256xf32, #tpu.memory_space<vmem>>, vector<8x256xf32>
    %c0_1 = arith.constant 0 : index
    %c0_2 = arith.constant 0 : index
    %1 = vector.load %arg2[%c0_1, %c0_2] : memref<256x128xf32, #tpu.memory_space<vmem>>, vector<256x128xf32>
    %cst = arith.constant dense<0.000000e+00> : vector<8x128xf32>
    %2 = tpu.matmul %0, %1, %cst {dimension_numbers = #tpu.dot_dimension_numbers<[1], [0], [0], [1], [0, 0, 1, 1], [], []>} : vector<8x256xf32>, vector<256x128xf32>, vector<8x128xf32> -> vector<8x128xf32>
    %c0_3 = arith.constant 0 : index
    %c0_4 = arith.constant 0 : index
    %3 = vector.load %arg3[%c0_3, %c0_4] : memref<1x128xf32, #tpu.memory_space<vmem>>, vector<1x128xf32>
    %4 = vector.broadcast %3 : vector<1x128xf32> to vector<8x128xf32>
    %5 = arith.addf %2, %4 : vector<8x128xf32>
    %6 = arith.negf %5 : vector<8x128xf32>
    %7 = math.exp %6 : vector<8x128xf32>
    %cst_5 = arith.constant 1.000000e+00 : f32
    %8 = vector.broadcast %cst_5 : f32 to vector<8x128xf32>
    %9 = arith.addf %8, %7 : vector<8x128xf32>
    %10 = arith.divf %8, %9 : vector<8x128xf32>
    %c0_6 = arith.constant 0 : index
    %c0_7 = arith.constant 0 : index
    %11 = vector.load %arg6[%c0_6, %c0_7] : memref<8x128xf32, #tpu.memory_space<vmem>>, vector<8x128xf32>
    tpu.vector_store %arg6[%c0_6, %c0_7], %10 {strides = array<i32>} : memref<8x128xf32, #tpu.memory_space<vmem>>, vector<8x128xf32>,
    %c0_8 = arith.constant 0 : index
    %c0_9 = arith.constant 0 : index
    %12 = vector.load %arg4[%c0_8, %c0_9] : memref<128x256xf32, #tpu.memory_space<vmem>>, vector<128x256xf32>
    %cst_10 = arith.constant dense<0.000000e+00> : vector<8x256xf32>
    %13 = tpu.matmul %10, %12, %cst_10 {dimension_numbers = #tpu.dot_dimension_numbers<[1], [0], [0], [1], [0, 0, 1, 1], [], []>} : vector<8x128xf32>, vector<128x256xf32>, vector<8x256xf32> -> vector<8x256xf32>
    %c0_11 = arith.constant 0 : index
    %c0_12 = arith.constant 0 : index
    %14 = vector.load %arg5[%c0_11, %c0_12] : memref<1x256xf32, #tpu.memory_space<vmem>>, vector<1x256xf32>
    %15 = vector.broadcast %14 : vector<1x256xf32> to vector<8x256xf32>
    %16 = arith.addf %13, %15 : vector<8x256xf32>
    %17 = arith.negf %16 : vector<8x256xf32>
    %18 = math.exp %17 : vector<8x256xf32>
    %cst_13 = arith.constant 1.000000e+00 : f32
    %19 = vector.broadcast %cst_13 : f32 to vector<8x256xf32>
    %20 = arith.addf %19, %18 : vector<8x256xf32>
    %21 = arith.divf %19, %20 : vector<8x256xf32>
    %c0_14 = arith.constant 0 : index
    %c0_15 = arith.constant 0 : index
    %22 = vector.load %arg7[%c0_14, %c0_15] : memref<8x256xf32, #tpu.memory_space<vmem>>, vector<8x256xf32>
    tpu.vector_store %arg7[%c0_14, %c0_15], %21 {strides = array<i32>} : memref<8x256xf32, #tpu.memory_space<vmem>>, vector<8x256xf32>,
    return
  }
  func.func @transform_0(%arg0: i32) -> (i32, i32) {
    %c0_i32 = arith.constant 0 : i32
    %c0_i32_0 = arith.constant 0 : i32
    return %arg0, %c0_i32 : i32, i32
  }
  func.func @transform_1(%arg0: i32) -> (i32, i32) {
    %c0_i32 = arith.constant 0 : i32
    %c0_i32_0 = arith.constant 0 : i32
    %c0_i32_1 = arith.constant 0 : i32
    return %c0_i32, %c0_i32_0 : i32, i32
  }
  func.func @transform_2(%arg0: i32) -> (i32, i32) {
    %c0_i32 = arith.constant 0 : i32
    %c0_i32_0 = arith.constant 0 : i32
    %c0_i32_1 = arith.constant 0 : i32
    return %c0_i32, %c0_i32_0 : i32, i32
  }
  func.func @transform_3(%arg0: i32) -> (i32, i32) {
    %c0_i32 = arith.constant 0 : i32
    %c0_i32_0 = arith.constant 0 : i32
    %c0_i32_1 = arith.constant 0 : i32
    return %c0_i32, %c0_i32_0 : i32, i32
  }
  func.func @transform_4(%arg0: i32) -> (i32, i32) {
    %c0_i32 = arith.constant 0 : i32
    %c0_i32_0 = arith.constant 0 : i32
    %c0_i32_1 = arith.constant 0 : i32
    return %c0_i32, %c0_i32_0 : i32, i32
  }
  func.func @transform_5(%arg0: i32) -> (i32, i32) {
    %c0_i32 = arith.constant 0 : i32
    %c0_i32_0 = arith.constant 0 : i32
    return %arg0, %c0_i32 : i32, i32
  }
  func.func @transform_6(%arg0: i32) -> (i32, i32) {
    %c0_i32 = arith.constant 0 : i32
    %c0_i32_0 = arith.constant 0 : i32
    return %arg0, %c0_i32 : i32, i32
  }
}

</mosaic_0001>

<bundles_post_ra>
// kernel: svd_fc_forward.1
= control target key start
LH: loop header
LB: loop body
LE: loop exit
PB: predicated region body
PF: predicated region fallthrough
CT: control target
= control target key end

     0   :  { %12 = vsyncpa [#allocation3], 0  ;;  %s731_s0 = inlined_call_operand.vmem [shape: f32[8,256], index: 0, kind: input, shape index: {}]   ;;  %s732_s1 = inlined_call_operand.vmem [shape: f32[256,128], index: 1, kind: input, shape index: {}]   ;;  %s733_s2 = inlined_call_operand.vmem [shape: f32[1,128], index: 2, kind: input, shape index: {}]   ;;  %s734_s3 = inlined_call_operand.vmem [shape: f32[128,256], index: 3, kind: input, shape index: {}]   ;;  %s735_s4 = inlined_call_operand.vmem [shape: f32[1,256], index: 4, kind: input, shape index: {}]   ;;  %s736_s5 = inlined_call_operand.hbm [shape: f32[8,128], index: 5, kind: output, shape index: {0}]   ;;  %s737_s6 = inlined_call_operand.hbm [shape: f32[8,256], index: 6, kind: output, shape index: {1}]  }
   0x1   :  { %v42_v0 = vld [vmem:[%s732_s1 + $0x80] sm:$0xff]  ;;  %v43_v1 = vld [vmem:[%s732_s1 + $0x88] sm:$0xff]  ;;  %v44_v5 = vld [vmem:[%s732_s1 + $0x90] sm:$0xff] }
   0x2   :  { %v26_v2 = vld [vmem:[%s732_s1] sm:$0xff]  ;;  %v338_v3 = vpack.c.bf16 %v43_v1, %v42_v0  ;;  %v27_v4 = vld [vmem:[%s732_s1 + $0x8] sm:$0xff]  ;;  %v45_v6 = vld [vmem:[%s732_s1 + $0x98] sm:$0xff] }
   0x3   :  { %v340_v7 = vpack.c.bf16 %v27_v4, %v26_v2  ;;  %v342_v8 = vpack.c.bf16 %v45_v6, %v44_v5  ;;  %v28_v9 = vld [vmem:[%s732_s1 + $0x10] sm:$0xff]  ;;  %v29_v10 = vld [vmem:[%s732_s1 + $0x18] sm:$0xff]  ;;  %v46_v11 = vld [vmem:[%s732_s1 + $0xa0] sm:$0xff] }
   0x4   :  { %339 = vmatprep.subr.bf16.mxu0 %v338_v3  ;;  %v47_v12 = vld [vmem:[%s732_s1 + $0xa8] sm:$0xff]  ;;  %v344_v13 = vpack.c.bf16 %v29_v10, %v28_v9  ;;  %v30_v15 = vld [vmem:[%s732_s1 + $0x20] sm:$0xff]  ;;  %v48_v17 = vld [vmem:[%s732_s1 + $0xb0] sm:$0xff] }
   0x5   :  { %341 = vmatpush3.bf16.msra.mxu0 %v340_v7  ;;  %v346_v14 = vpack.c.bf16 %v47_v12, %v46_v11  ;;  %v31_v16 = vld [vmem:[%s732_s1 + $0x28] sm:$0xff]  ;;  %v49_v18 = vld [vmem:[%s732_s1 + $0xb8] sm:$0xff]  ;;  %v32_v21 = vld [vmem:[%s732_s1 + $0x30] sm:$0xff] }
   0x6   :  { %343 = vmatprep.subr.bf16.mxu0 %v342_v8  ;;  %v348_v19 = vpack.c.bf16 %v31_v16, %v30_v15  ;;  %v350_v20 = vpack.c.bf16 %v49_v18, %v48_v17  ;;  %v33_v22 = vld [vmem:[%s732_s1 + $0x38] sm:$0xff]  ;;  %v50_v23 = vld [vmem:[%s732_s1 + $0xc0] sm:$0xff]  ;;  %v51_v24 = vld [vmem:[%s732_s1 + $0xc8] sm:$0xff] }
   0x7   :  { %v25_v25 = vld [vmem:[%s731_s0 + $0x8] sm:$0xff] }
   0x8   :  { %129 = vmatprep.mubr.f32.mxu0 %v25_v25 }
   0x9   :  { %345 = vmatpush3.bf16.msra.mxu0 %v344_v13 }
   0xa   :  { %347 = vmatprep.subr.bf16.mxu0 %v346_v14 }
   0xb   :  { %13 = vsyncpa [#allocation5], 0  ;;  %v352_v26 = vpack.c.bf16 %v33_v22, %v32_v21  ;;  %v354_v27 = vpack.c.bf16 %v51_v24, %v50_v23  ;;  %v34_v28 = vld [vmem:[%s732_s1 + $0x40] sm:$0xff]  ;;  %v35_v29 = vld [vmem:[%s732_s1 + $0x48] sm:$0xff] }
   0xc   :  { %v52_v30 = vld [vmem:[%s732_s1 + $0xd0] sm:$0xff]  ;;  %v53_v31 = vld [vmem:[%s732_s1 + $0xd8] sm:$0xff]  ;;  %v356_v32 = vpack.c.bf16 %v35_v29, %v34_v28  ;;  %v54_v36 = vld [vmem:[%s732_s1 + $0xe0] sm:$0xff] }
   0xd   :  { %349 = vmatpush3.bf16.msra.mxu0 %v348_v19  ;;  %v358_v33 = vpack.c.bf16 %v53_v31, %v52_v30  ;;  %v36_v34 = vld [vmem:[%s732_s1 + $0x50] sm:$0xff]  ;;  %v37_v35 = vld [vmem:[%s732_s1 + $0x58] sm:$0xff]  ;;  %v55_v37 = vld [vmem:[%s732_s1 + $0xe8] sm:$0xff] }
   0xe   :  { %351 = vmatprep.subr.bf16.mxu0 %v350_v20  ;;  %v360_v38 = vpack.c.bf16 %v37_v35, %v36_v34  ;;  %v362_v39 = vpack.c.bf16 %v55_v37, %v54_v36  ;;  %v38_v40 = vld [vmem:[%s732_s1 + $0x60] sm:$0xff]  ;;  %v39_v41 = vld [vmem:[%s732_s1 + $0x68] sm:$0xff]  ;;  %v56_v42 = vld [vmem:[%s732_s1 + $0xf0] sm:$0xff]  ;;  %v465_v34 = vmov 0.0  }
   0xf   :  { %v57_v43 = vld [vmem:[%s732_s1 + $0xf8] sm:$0xff]  ;;  %v364_v44 = vpack.c.bf16 %v39_v41, %v38_v40  ;;  %v40_v46 = vld [vmem:[%s732_s1 + $0x70] sm:$0xff]  ;;  %v24_v49 = vld [vmem:[%s731_s0] sm:$0xff]  ;;  %250 = vmatprep.mubr.f32.mxu1 %v465_v34 }
  0x10   :  { %v366_v45 = vpack.c.bf16 %v57_v43, %v56_v42  ;;  %v41_v47 = vld [vmem:[%s732_s1 + $0x78] sm:$0xff]  ;;  %v143_v50 = vld [vmem:[%s734_s3 + $0x8] sm:$0xff]  ;;  %v142_v53 = vld [vmem:[%s734_s3] sm:$0xff] }
  0x11   :  { %353 = vmatpush3.bf16.msra.mxu0 %v352_v26  ;;  %v368_v48 = vpack.c.bf16 %v41_v47, %v40_v46  ;;  %v145_v51 = vld [vmem:[%s734_s3 + $0x18] sm:$0xff]  ;;  %v144_v54 = vld [vmem:[%s734_s3 + $0x10] sm:$0xff]  ;;  %v147_v56 = vld [vmem:[%s734_s3 + $0x28] sm:$0xff] }
  0x12   :  { %355 = vmatprep.subr.bf16.mxu0 %v354_v27  ;;  %v370_v52 = vpack.c.bf16 %v145_v51, %v143_v50  ;;  %v372_v55 = vpack.c.bf16 %v144_v54, %v142_v53  ;;  %v149_v57 = vld [vmem:[%s734_s3 + $0x38] sm:$0xff]  ;;  %v146_v59 = vld [vmem:[%s734_s3 + $0x20] sm:$0xff]  ;;  %v148_v60 = vld [vmem:[%s734_s3 + $0x30] sm:$0xff] }
  0x13   :  { %v374_v58 = vpack.c.bf16 %v149_v57, %v147_v56  ;;  %v376_v61 = vpack.c.bf16 %v148_v60, %v146_v59  ;;  %v151_v62 = vld [vmem:[%s734_s3 + $0x48] sm:$0xff]  ;;  %v153_v63 = vld [vmem:[%s734_s3 + $0x58] sm:$0xff]  ;;  %v150_v1 = vld [vmem:[%s734_s3 + $0x40] sm:$0xff] }
  0x14   :  { %371 = vmatprep.subr.bf16.mxu1 %v370_v52  ;;  %v378_v0 = vpack.c.bf16 %v153_v63, %v151_v62  ;;  %v152_v2 = vld [vmem:[%s734_s3 + $0x50] sm:$0xff]  ;;  %v155_v4 = vld [vmem:[%s734_s3 + $0x68] sm:$0xff]  ;;  %v157_v5 = vld [vmem:[%s734_s3 + $0x78] sm:$0xff] }
  0x15   :  { %357 = vmatpush3.bf16.msra.mxu0 %v356_v32  ;;  %373 = vmatpush1.bf16.msra.mxu1 %v372_v55  ;;  %v380_v3 = vpack.c.bf16 %v152_v2, %v150_v1  ;;  %v382_v6 = vpack.c.bf16 %v157_v5, %v155_v4  ;;  %v154_v7 = vld [vmem:[%s734_s3 + $0x60] sm:$0xff]  ;;  %v156_v8 = vld [vmem:[%s734_s3 + $0x70] sm:$0xff]  ;;  %v159_v10 = vld [vmem:[%s734_s3 + $0x88] sm:$0xff] }
  0x16   :  { %359 = vmatprep.subr.bf16.mxu0 %v358_v33  ;;  %375 = vmatprep.subr.bf16.mxu1 %v374_v58  ;;  %v384_v9 = vpack.c.bf16 %v156_v8, %v154_v7  ;;  %v161_v11 = vld [vmem:[%s734_s3 + $0x98] sm:$0xff]  ;;  %v158_v13 = vld [vmem:[%s734_s3 + $0x80] sm:$0xff]  ;;  %v160_v14 = vld [vmem:[%s734_s3 + $0x90] sm:$0xff] }
  0x17   :  { %v386_v12 = vpack.c.bf16 %v161_v11, %v159_v10  ;;  %v388_v15 = vpack.c.bf16 %v160_v14, %v158_v13  ;;  %v163_v16 = vld [vmem:[%s734_s3 + $0xa8] sm:$0xff]  ;;  %v165_v17 = vld [vmem:[%s734_s3 + $0xb8] sm:$0xff]  ;;  %v162_v19 = vld [vmem:[%s734_s3 + $0xa0] sm:$0xff] }
  0x18   :  { %v390_v18 = vpack.c.bf16 %v165_v17, %v163_v16  ;;  %v164_v20 = vld [vmem:[%s734_s3 + $0xb0] sm:$0xff]  ;;  %v167_v22 = vld [vmem:[%s734_s3 + $0xc8] sm:$0xff]  ;;  %v169_v23 = vld [vmem:[%s734_s3 + $0xd8] sm:$0xff] }
  0x19   :  { %361 = vmatpush3.bf16.msra.mxu0 %v360_v38  ;;  %377 = vmatpush1.bf16.msra.mxu1 %v376_v61  ;;  %v392_v21 = vpack.c.bf16 %v164_v20, %v162_v19  ;;  %v394_v24 = vpack.c.bf16 %v169_v23, %v167_v22  ;;  %v166_v25 = vld [vmem:[%s734_s3 + $0xc0] sm:$0xff]  ;;  %v168_v26 = vld [vmem:[%s734_s3 + $0xd0] sm:$0xff]  ;;  %v171_v28 = vld [vmem:[%s734_s3 + $0xe8] sm:$0xff] }
  0x1a   :  { %363 = vmatprep.subr.bf16.mxu0 %v362_v39  ;;  %379 = vmatprep.subr.bf16.mxu1 %v378_v0  ;;  %v396_v27 = vpack.c.bf16 %v168_v26, %v166_v25  ;;  %v173_v29 = vld [vmem:[%s734_s3 + $0xf8] sm:$0xff]  ;;  %v170_v31 = vld [vmem:[%s734_s3 + $0xe0] sm:$0xff]  ;;  %v172_v32 = vld [vmem:[%s734_s3 + $0xf0] sm:$0xff]  ;;  %s466_s3 = smov [#allocation2]  }
  0x1b   :  { %v398_v30 = vpack.c.bf16 %v173_v29, %v171_v28  ;;  %v400_v33 = vpack.c.bf16 %v172_v32, %v170_v31  ;;  %v299_v36 = vld [vmem:[%s733_s2] ss:$0 sm:$0xff]  ;;  %s277_s29 = sshll.u32 %s466_s3, 4  ;;  %s278_s29 = int_to_ptr.vmem [resolvable:$true] %s277_s29 }
  0x1c   :  { %s417_s30 = scalar_lea.vmem %s278_s29, 128  ;;  %p422_p1 = scmp.lt.s32.totalorder %s278_s29, %s278_s29 }
  0x1d   :  { %365 = vmatpush3.bf16.msra.mxu0 %v364_v44  ;;  %381 = vmatpush1.bf16.msra.mxu1 %v380_v3  ;;  %p418_p0 = scmp.ne.s32.totalorder %s278_s29, %s417_s30  ;;  %p423_p2 = scmp.lt.s32.totalorder %s417_s30, %s417_s30 }
  0x1e   :  { %367 = vmatprep.subr.bf16.mxu0 %v366_v45  ;;  %383 = vmatprep.subr.bf16.mxu1 %v382_v6 }
  0x1f   :  { %p424_p3 = por %p423_p2, %p422_p1 }
  0x21   :  { %369 = vmatpush3.bf16.msra.mxu0 %v368_v48  ;;  %385 = vmatpush1.bf16.msra.mxu1 %v384_v9  ;;  %p425_p4 = pnand %p424_p3, %p418_p0 }
  0x22   :  { %387 = vmatprep.subr.bf16.mxu1 %v386_v12 }
  0x24   :  { %130 = vmatmul.mubr.f32.vlgmr.msra.gmra.mrb[0].mxu0 %v24_v49 }
  0x25   :  { %389 = vmatpush1.bf16.msra.mxu1 %v388_v15 }
  0x26   :  { %391 = vmatprep.subr.bf16.mxu1 %v390_v18 }
  0x29   :  { %393 = vmatpush1.bf16.msra.mxu1 %v392_v21 }
  0x2a   :  { %395 = vmatprep.subr.bf16.mxu1 %v394_v24 }
  0x2d   :  { %397 = vmatpush1.bf16.msra.mxu1 %v396_v27 }
  0x2e   :  { %399 = vmatprep.subr.bf16.mxu1 %v398_v30 }
  0x31   :  { %401 = vmatpush1.bf16.msra.mxu1 %v400_v33 }
  0xf7   :  { %v335_v35 = vpop.f32.mrb[0].mxu0 }
  0xf8   :  { %v336_v37 = vpop.f32.mrb[1].mxu0 }
  0xf9   :  { %v337_v38 = vadd.f32 %v336_v37, %v335_v35 }
  0xfb   :  { %v132_v39 = vadd.f32 %v337_v38, %v299_v36 }
  0xfd   :  { %v300_v40 = vmul.f32 -1.442695, %v132_v39 }
  0xff   :  { %405 = vpow2.f32 %v300_v40 }
 0x109   :  { %v406_v41 = vpop.eup %405 }
 0x10a   :  { %v138_v42 = vadd.f32 1.0, %v406_v41 }
 0x10c   :  { %407 = vrcp.f32 %v138_v42 }
 0x116   :  { %v408_v43 = vpop.eup %407 }
 0x117   :  { %141 = vst [vmem:[#allocation2] sm:$0xff] %v408_v43  ;;  %251 = vmatmul.mubr.f32.vlgmr.msra.gmra.mrb[0].mxu1 %v408_v43 }
 0x118   :  { %428 = shalt.err (!%p425_p4)
}
 0x119   :  { %s429_s8 = scalar_lea.hbm %s736_s5, 128 }
 0x11a   :  { %p430_p5 = scmp.ne.s32.totalorder %s736_s5, %s429_s8  ;;  %p433_p6 = scmp.lt.u32.totalorder %s429_s8, %s736_s5 }
 0x11c   :  { %p435_p7 = pnand %p433_p6, %p430_p5 }
 0x11e   :  { %438 = shalt.err (!%p435_p7)
}
 0x11f   :  { %280 = dma.vmem_to_hbm [thread:$0]  %s278_s29, 128, %s736_s5, [#allocation3]   ;;  %v176_v44 = vlaneseq  ;;  %v174_v47 = vld [vmem:[%s735_s4] sm:$0x3] }
 0x120   :  { %s467_s5 = smov [#allocation4]  }
 0x121   :  { %v177_v45 = vshrl.u32 %v176_v44, 7  ;;  %s287_s17 = sshll.u32 %s467_s5, 4  ;;  %s288_s17 = int_to_ptr.vmem [resolvable:$true] %s287_s17 }
 0x122   :  { %s439_s4 = scalar_lea.vmem %s288_s17, 256  ;;  %p444_p9 = scmp.lt.s32.totalorder %s288_s17, %s288_s17 }
 0x123   :  { %v178_v46 = vsub.s32 0, %v177_v45  ;;  %v182_v48 = vsub.s32 1, %v177_v45  ;;  %p440_p8 = scmp.ne.s32.totalorder %s288_s17, %s439_s4  ;;  %p445_p10 = scmp.lt.s32.totalorder %s439_s4, %s439_s4 }
 0x125   :  { %v179_v49 = vrot.slane %v174_v47, %v178_v46  ;;  %v183_v50 = vrot.slane %v174_v47, %v182_v48  ;;  %p446_p11 = por %p445_p10, %p444_p9 }
 0x127   :  { %p447_p12 = pnand %p446_p11, %p440_p8 }
 0x1ea   :  { %v252_v51 = vpop.f32.mrb[0].mxu1 }
 0x1eb   :  { %v253_v52 = vadd.f32 %v252_v51, %v179_v49  ;;  %v254_v53 = vpop.f32.mrb[1].mxu1 }
 0x1ec   :  { %v255_v54 = vadd.f32 %v254_v53, %v183_v50 }
 0x1ed   :  { %v301_v55 = vmul.f32 -1.442695, %v253_v52 }
 0x1ee   :  { %v302_v56 = vmul.f32 -1.442695, %v255_v54 }
 0x1ef   :  { %409 = vpow2.f32 %v301_v55 }
 0x1f0   :  { %411 = vpow2.f32 %v302_v56 }
 0x1f9   :  { %v410_v57 = vpop.eup %409 }
 0x1fa   :  { %v412_v58 = vpop.eup %411  ;;  %v263_v59 = vadd.f32 1.0, %v410_v57 }
 0x1fb   :  { %v264_v60 = vadd.f32 1.0, %v412_v58 }
 0x1fc   :  { %413 = vrcp.f32 %v263_v59 }
 0x1fd   :  { %415 = vrcp.f32 %v264_v60 }
 0x206   :  { %v414_v61 = vpop.eup %413 }
 0x207   :  { %v416_v62 = vpop.eup %415  ;;  %269 = vst [vmem:[#allocation4] sm:$0xff] %v414_v61 }
 0x208   :  { %270 = vst [vmem:[#allocation4 + $0x8] sm:$0xff] %v416_v62 }
 0x209   :  { %450 = shalt.err (!%p447_p12)
}
 0x20a   :  { %s451_s20 = scalar_lea.hbm %s737_s6, 256 }
 0x20b   :  { %p452_p13 = scmp.ne.s32.totalorder %s737_s6, %s451_s20  ;;  %p455_p0 = scmp.lt.u32.totalorder %s451_s20, %s737_s6 }
 0x20d   :  { %p457_p1 = pnand %p455_p0, %p452_p13 }
 0x20f   :  { %460 = shalt.err (!%p457_p1)
}
 0x210   :  { %290 = dma.vmem_to_hbm [thread:$0]  %s288_s17, 256, %s737_s6, [#allocation5]  }
 0x211   :  { %461 = dma.done.wait [#allocation3], 128  }
 0x212   :  { %462 = vsyncadd [#allocation3], 4294967168 }
 0x213   :  { %463 = dma.done.wait [#allocation5], 256  }
 0x214   :  { %464 = vsyncadd [#allocation5], 4294967040 }
 0x215   :  { %297 = vsyncpa [#allocation3], 1 }
 0x216   :  { %298 = vsyncpa [#allocation5], 1 }

</bundles_post_ra>
